<compile_context>
chip_gen: v5e
topology: v5e:2x2
jax: 0.10.0
libtpu: 0.0.40
codegen_flags: <defaults>
</compile_context>

<pallas_src>
import functools
import math

import jax
import jax.numpy as jnp
import numpy as np
from jax.experimental import pallas as pl
from jax.experimental.pallas import tpu as pltpu


def _au_prompt_kernel(t_ref, freqs_ref, w1_ref, b1_ref, w2_ref, b2_ref, o_ref,
                      *, split_first_dot):
    # t_ref:     [TN, 1]   f32  timesteps for this row tile
    # freqs_ref: [1, half] f32  sinusoid frequency table (constant)
    # w1_ref:    [D, D]    bf16 first linear weight  ([in, out])
    # b1_ref:    [1, D]    f32
    # w2_ref:    [D, D]    bf16 second linear weight ([in, out])
    # b2_ref:    [1, D]    f32
    # o_ref:     [TN, D]   out dtype
    half = freqs_ref.shape[1]

    args = t_ref[...] * freqs_ref[...]            # [TN, half] f32 (scale = 1)
    s = jnp.sin(args)
    c = jnp.cos(args)

    if split_first_dot:
        # v5e (4x128x128 MXU): K=128 is a perfect fit -> concat-free split form.
        # Static slices at the 128-row boundary are tile-aligned (no copy).
        h = (jnp.dot(s.astype(jnp.bfloat16), w1_ref[:half, :],
                     preferred_element_type=jnp.float32)
             + jnp.dot(c.astype(jnp.bfloat16), w1_ref[half:, :],
                       preferred_element_type=jnp.float32))
    else:
        # v6e/v7x (2x256x256 MXU): lane-concat of two adjacent 128-lane tiles
        # is near-free; one K=2*half dot fills the systolic depth.
        emb = jnp.concatenate([s, c], axis=-1).astype(jnp.bfloat16)
        h = jnp.dot(emb, w1_ref[...], preferred_element_type=jnp.float32)

    h = jnp.maximum(h + b1_ref[...], 0.0)         # bias + ReLU in f32

    out = jnp.dot(h.astype(jnp.bfloat16), w2_ref[...],
                  preferred_element_type=jnp.float32) + b2_ref[...]
    o_ref[...] = out.astype(o_ref.dtype)


def prepare_au_prompt_params(w1, b1, w2, b2, *, freq_shift=1.0):
    """One-time parameter prep (keep out of the per-call path).

    w1/w2 are stored [in, out] (transposed relative to PyTorch's [out, in]).
    Returns (freqs [1,half] f32, w1 bf16, b1 [1,D] f32, w2 bf16, b2 [1,D] f32).
    """
    D = w1.shape[0]
    assert w1.shape == (D, D) and w2.shape == (D, D)
    assert b1.shape == (D,) and b2.shape == (D,)
    assert D % 2 == 0 and (D // 2) % 128 == 0, (
        "embed_dim/2 must be lane-aligned (multiple of 128)")
    half = D // 2
    exponent = (-math.log(10000.0) * jnp.arange(half, dtype=jnp.float32)
                / (half - freq_shift))
    freqs = jnp.exp(exponent).reshape(1, half)
    return (freqs,
            jnp.asarray(w1, dtype=jnp.bfloat16),
            jnp.asarray(b1, dtype=jnp.float32).reshape(1, D),
            jnp.asarray(w2, dtype=jnp.bfloat16),
            jnp.asarray(b2, dtype=jnp.float32).reshape(1, D))


def _default_split_first_dot():
    # Split K=128 form only on v5e (128-deep MXU); single K=256 dot elsewhere.
    try:
        kind = jax.devices()[0].device_kind.lower()
    except Exception:
        return False
    return "v5" in kind


def _choose_tiling(n_rows, *, max_tile=1024):
    """Pick (tile_n, grid_n) with tile_n a multiple of 8 and minimal padding."""
    n8 = ((n_rows + 7) // 8) * 8            # round up to f32 sublane tile
    if n8 <= 256:
        grid_n = 1                          # tiny problem: one step is cheapest
    elif n8 <= 2 * max_tile:
        grid_n = 2                          # >= 2 steps so both v7x TCs run
    else:
        grid_n = pl.cdiv(n8, max_tile)
    tile_n = ((pl.cdiv(n8, grid_n) + 7) // 8) * 8
    return tile_n, grid_n


def au_to_prompt_embed(au_diff, params, *, out_dtype=jnp.float32,
                       split_first_dot=None, max_tile=1024):
    """au_diff: [B, S] float; params: output of prepare_au_prompt_params."""
    freqs, w1b, b1_2d, w2b, b2_2d = params
    B, S = au_diff.shape
    half = freqs.shape[1]
    D = 2 * half
    N = B * S

    if split_first_dot is None:
        split_first_dot = _default_split_first_dot()

    tile_n, grid_n = _choose_tiling(N, max_tile=max_tile)
    Np = tile_n * grid_n

    t_flat = au_diff.astype(jnp.float32).reshape(N, 1)
    if Np != N:
        # Padded rows see t=0 (sin=0, cos=1): finite, sliced off afterwards.
        t_flat = jnp.pad(t_flat, ((0, Np - N), (0, 0)))

    kernel = functools.partial(_au_prompt_kernel,
                               split_first_dot=split_first_dot)

    out_itemsize = jnp.dtype(out_dtype).itemsize
    cost = pl.CostEstimate(
        flops=4 * Np * D * D + 3 * Np * D,          # two DxD matmuls + bias/relu
        transcendentals=2 * Np * half,              # sin, cos
        bytes_accessed=(Np * 4                      # timesteps
                        + half * 4 + 2 * D * 4      # freqs + biases
                        + 2 * D * D * 2             # bf16 weights
                        + Np * D * out_itemsize),   # output
    )

    # Constant-index (resident) inputs: fetch once, single-buffered.
    resident = dict(pipeline_mode=pl.Buffered(1))

    out_flat = pl.pallas_call(
        kernel,
        out_shape=jax.ShapeDtypeStruct((Np, D), out_dtype),
        grid_spec=pltpu.PrefetchScalarGridSpec(
            num_scalar_prefetch=0,
            grid=(grid_n,),
            in_specs=[
                pl.BlockSpec((tile_n, 1), lambda i: (i, 0)),          # t tile
                pl.BlockSpec((1, half), lambda i: (0, 0), **resident),  # freqs
                pl.BlockSpec((D, D), lambda i: (0, 0), **resident),     # w1
                pl.BlockSpec((1, D), lambda i: (0, 0), **resident),     # b1
                pl.BlockSpec((D, D), lambda i: (0, 0), **resident),     # w2
                pl.BlockSpec((1, D), lambda i: (0, 0), **resident),     # b2
            ],
            out_specs=pl.BlockSpec((tile_n, D), lambda i: (i, 0)),
        ),
        compiler_params=pltpu.CompilerParams(
            dimension_semantics=("parallel",)),
        cost_estimate=cost,
    )(t_flat, freqs, w1b, b1_2d, w2b, b2_2d)

    if Np != N:
        out_flat = out_flat[:N]
    return out_flat.reshape(B, S, D)


def _reference(au_diff, w1, b1, w2, b2, *, freq_shift=1.0):
    """Pure-JAX f32 reference mirroring the PyTorch module."""
    D = w1.shape[0]
    half = D // 2
    exponent = -math.log(10000.0) * jnp.arange(half, dtype=jnp.float32)
    exponent = exponent / (half - freq_shift)
    freqs = jnp.exp(exponent)
    args = au_diff.astype(jnp.float32)[..., None] * freqs          # [B, S, half]
    emb = jnp.concatenate([jnp.sin(args), jnp.cos(args)], axis=-1)
    h = jnp.maximum(emb @ w1 + b1, 0.0)
    return h @ w2 + b2


if __name__ == "__main__":
    # Small shapes consistent with the module: batch=2, seq=8, embed_dim=256.
    B, S, D = 2, 8, 256
    key = jax.random.PRNGKey(0)
    k_x, k_w1, k_b1, k_w2, k_b2 = jax.random.split(key, 5)

    au_diff = jax.random.normal(k_x, (B, S), dtype=jnp.float32)

    # Deterministic synthetic parameters (Linear weights stored [in, out],
    # i.e. already transposed relative to PyTorch's [out, in]).
    w1 = jax.random.normal(k_w1, (D, D), dtype=jnp.float32) * (1.0 / math.sqrt(D))
    b1 = jax.random.normal(k_b1, (D,), dtype=jnp.float32) * 0.01
    w2 = jax.random.normal(k_w2, (D, D), dtype=jnp.float32) * (1.0 / math.sqrt(D))
    b2 = jax.random.normal(k_b2, (D,), dtype=jnp.float32) * 0.01

    # One-time parameter prep (bf16 weights, freqs table) -- NOT per call.
    params = prepare_au_prompt_params(w1, b1, w2, b2, freq_shift=1.0)

    out = au_to_prompt_embed(au_diff, params)
    out = jax.block_until_ready(out)

    ref = jax.block_until_ready(
        _reference(au_diff, w1, b1, w2, b2, freq_shift=1.0))
    # bf16 MXU operands (f32 accumulation) -> loosened tolerance vs. f32 ref.
    np.testing.assert_allclose(np.asarray(out), np.asarray(ref),
                               rtol=3e-2, atol=3e-2)

    assert out.shape == (B, S, D) and out.dtype == jnp.float32
    print("KERNEL_OK")
</pallas_src>

<mosaic_0001>
module attributes {stable_mosaic.version = 11 : i64} {
  func.func @_au_prompt_kernel(%arg0: i32, %arg1: memref<16x1xf32, #tpu.memory_space<vmem>>, %arg2: memref<1x128xf32, #tpu.memory_space<vmem>>, %arg3: memref<256x256xbf16, #tpu.memory_space<vmem>>, %arg4: memref<1x256xf32, #tpu.memory_space<vmem>>, %arg5: memref<256x256xbf16, #tpu.memory_space<vmem>>, %arg6: memref<1x256xf32, #tpu.memory_space<vmem>>, %arg7: memref<16x256xf32, #tpu.memory_space<vmem>>) attributes {dimension_semantics = [#tpu.dimension_semantics<parallel>], iteration_bounds = array<i64: 1>, scalar_prefetch = 0 : i64, scratch_operands = 0 : i64, tpu.core_type = #tpu.core_type<tc>, window_params = [{transform_indices = @transform_0, window_bounds = array<i64: 16, 1>}, {pipeline_mode = #tpu.pipeline_mode<synchronous>, transform_indices = @transform_1, window_bounds = array<i64: 1, 128>}, {pipeline_mode = #tpu.pipeline_mode<synchronous>, transform_indices = @transform_2, window_bounds = array<i64: 256, 256>}, {pipeline_mode = #tpu.pipeline_mode<synchronous>, transform_indices = @transform_3, window_bounds = array<i64: 1, 256>}, {pipeline_mode = #tpu.pipeline_mode<synchronous>, transform_indices = @transform_4, window_bounds = array<i64: 256, 256>}, {pipeline_mode = #tpu.pipeline_mode<synchronous>, transform_indices = @transform_5, window_bounds = array<i64: 1, 256>}, {transform_indices = @transform_6, window_bounds = array<i64: 16, 256>}]} {
    %c0 = arith.constant 0 : index
    %c0_0 = arith.constant 0 : index
    %0 = vector.load %arg1[%c0, %c0_0] : memref<16x1xf32, #tpu.memory_space<vmem>>, vector<16x1xf32>
    %c0_1 = arith.constant 0 : index
    %c0_2 = arith.constant 0 : index
    %1 = vector.load %arg2[%c0_1, %c0_2] : memref<1x128xf32, #tpu.memory_space<vmem>>, vector<1x128xf32>
    %2 = vector.broadcast %0 : vector<16x1xf32> to vector<16x128xf32>
    %3 = vector.broadcast %1 : vector<1x128xf32> to vector<16x128xf32>
    %4 = arith.mulf %2, %3 : vector<16x128xf32>
    %5 = math.sin %4 : vector<16x128xf32>
    %6 = math.cos %4 : vector<16x128xf32>
    %7 = tpu.concatenate %5, %6 in 1 : vector<16x128xf32>, vector<16x128xf32> -> vector<16x256xf32>
    %8 = arith.truncf %7 : vector<16x256xf32> to vector<16x256xbf16>
    %c0_3 = arith.constant 0 : index
    %c0_4 = arith.constant 0 : index
    %9 = vector.load %arg3[%c0_3, %c0_4] : memref<256x256xbf16, #tpu.memory_space<vmem>>, vector<256x256xbf16>
    %cst = arith.constant dense<0.000000e+00> : vector<16x256xf32>
    %10 = tpu.matmul %8, %9, %cst {dimension_numbers = #tpu.dot_dimension_numbers<[1], [0], [0], [1], [0, 0, 1, 1], [], []>} : vector<16x256xbf16>, vector<256x256xbf16>, vector<16x256xf32> -> vector<16x256xf32>
    %c0_5 = arith.constant 0 : index
    %c0_6 = arith.constant 0 : index
    %11 = vector.load %arg4[%c0_5, %c0_6] : memref<1x256xf32, #tpu.memory_space<vmem>>, vector<1x256xf32>
    %12 = vector.broadcast %11 : vector<1x256xf32> to vector<16x256xf32>
    %13 = arith.addf %10, %12 : vector<16x256xf32>
    %cst_7 = arith.constant 0.000000e+00 : f32
    %14 = vector.broadcast %cst_7 : f32 to vector<16x256xf32>
    %15 = arith.maximumf %13, %14 : vector<16x256xf32>
    %16 = arith.truncf %15 : vector<16x256xf32> to vector<16x256xbf16>
    %c0_8 = arith.constant 0 : index
    %c0_9 = arith.constant 0 : index
    %17 = vector.load %arg5[%c0_8, %c0_9] : memref<256x256xbf16, #tpu.memory_space<vmem>>, vector<256x256xbf16>
    %cst_10 = arith.constant dense<0.000000e+00> : vector<16x256xf32>
    %18 = tpu.matmul %16, %17, %cst_10 {dimension_numbers = #tpu.dot_dimension_numbers<[1], [0], [0], [1], [0, 0, 1, 1], [], []>} : vector<16x256xbf16>, vector<256x256xbf16>, vector<16x256xf32> -> vector<16x256xf32>
    %c0_11 = arith.constant 0 : index
    %c0_12 = arith.constant 0 : index
    %19 = vector.load %arg6[%c0_11, %c0_12] : memref<1x256xf32, #tpu.memory_space<vmem>>, vector<1x256xf32>
    %20 = vector.broadcast %19 : vector<1x256xf32> to vector<16x256xf32>
    %21 = arith.addf %18, %20 : vector<16x256xf32>
    %c0_13 = arith.constant 0 : index
    %c0_14 = arith.constant 0 : index
    %22 = vector.load %arg7[%c0_13, %c0_14] : memref<16x256xf32, #tpu.memory_space<vmem>>, vector<16x256xf32>
    tpu.vector_store %arg7[%c0_13, %c0_14], %21 {strides = array<i32>} : memref<16x256xf32, #tpu.memory_space<vmem>>, vector<16x256xf32>,
    return
  }
  func.func @transform_0(%arg0: i32) -> (i32, i32) {
    %c0_i32 = arith.constant 0 : i32
    %c0_i32_0 = arith.constant 0 : i32
    return %arg0, %c0_i32 : i32, i32
  }
  func.func @transform_1(%arg0: i32) -> (i32, i32) {
    %c0_i32 = arith.constant 0 : i32
    %c0_i32_0 = arith.constant 0 : i32
    %c0_i32_1 = arith.constant 0 : i32
    return %c0_i32, %c0_i32_0 : i32, i32
  }
  func.func @transform_2(%arg0: i32) -> (i32, i32) {
    %c0_i32 = arith.constant 0 : i32
    %c0_i32_0 = arith.constant 0 : i32
    %c0_i32_1 = arith.constant 0 : i32
    return %c0_i32, %c0_i32_0 : i32, i32
  }
  func.func @transform_3(%arg0: i32) -> (i32, i32) {
    %c0_i32 = arith.constant 0 : i32
    %c0_i32_0 = arith.constant 0 : i32
    %c0_i32_1 = arith.constant 0 : i32
    return %c0_i32, %c0_i32_0 : i32, i32
  }
  func.func @transform_4(%arg0: i32) -> (i32, i32) {
    %c0_i32 = arith.constant 0 : i32
    %c0_i32_0 = arith.constant 0 : i32
    %c0_i32_1 = arith.constant 0 : i32
    return %c0_i32, %c0_i32_0 : i32, i32
  }
  func.func @transform_5(%arg0: i32) -> (i32, i32) {
    %c0_i32 = arith.constant 0 : i32
    %c0_i32_0 = arith.constant 0 : i32
    %c0_i32_1 = arith.constant 0 : i32
    return %c0_i32, %c0_i32_0 : i32, i32
  }
  func.func @transform_6(%arg0: i32) -> (i32, i32) {
    %c0_i32 = arith.constant 0 : i32
    %c0_i32_0 = arith.constant 0 : i32
    return %arg0, %c0_i32 : i32, i32
  }
}

</mosaic_0001>

<bundles_post_ra>
// kernel: tpu_custom_call.1
= control target key start
LH: loop header
LB: loop body
LE: loop exit
PB: predicated region body
PF: predicated region fallthrough
CT: control target
= control target key end

     0   :  { %11 = vsyncpa [#allocation3], 0  ;;  %s2056_s0 = inlined_call_operand.vmem [shape: f32[16,1], index: 0, kind: input, shape index: {}]   ;;  %s2057_s1 = inlined_call_operand.vmem [shape: f32[1,128], index: 1, kind: input, shape index: {}]   ;;  %s2058_s2 = inlined_call_operand.hbm [shape: bf16[256,256], index: 2, kind: input, shape index: {}]   ;;  %s2059_s3 = inlined_call_operand.vmem [shape: f32[1,256], index: 3, kind: input, shape index: {}]   ;;  %s2060_s4 = inlined_call_operand.hbm [shape: bf16[256,256], index: 4, kind: input, shape index: {}]   ;;  %s2061_s5 = inlined_call_operand.vmem [shape: f32[1,256], index: 5, kind: input, shape index: {}]   ;;  %s2062_s6 = inlined_call_operand.hbm [shape: f32[16,256], index: 6, kind: output, shape index: {}]  }
   0x1   :  { %12 = vsyncpa [#allocation6], 0 }
   0x2   :  { %13 = vsyncpa [#allocation4], 0  ;;  %s22_s23 = sshll.u32 %s2058_s2, 4  ;;  %s1658_s24 = smov [#allocation2]   ;;  %s23_s23 = int_to_ptr.hbm [resolvable:$true] %s22_s23 }
   0x3   :  { %s24_s25 = sshll.u32 %s1658_s24, 4  ;;  %s37_s28 = sshll.u32 %s2060_s4, 4  ;;  %s25_s25 = int_to_ptr.vmem [resolvable:$true] %s24_s25  ;;  %s38_s28 = int_to_ptr.hbm [resolvable:$true] %s37_s28 }
   0x4   :  { %s1659_s29 = smov 128   ;;  %s1660_s30 = smov 8  }
   0x5   :  { %30 = dma.hbm_to_vmem [thread:$0]  %s23_s23, 4096, %s25_s25, [#allocation3], %s1659_s29, %s1659_s29, %s1660_s30  }
   0x6   :  { %s1661_s7 = smov [#allocation5]  }
   0x7   :  { %s39_s8 = sshll.u32 %s1661_s7, 4  ;;  %s40_s8 = int_to_ptr.vmem [resolvable:$true] %s39_s8 }
   0x8   :  { %45 = dma.hbm_to_vmem [thread:$0]  %s38_s28, 4096, %s40_s8, [#allocation6], %s1659_s29, %s1659_s29, %s1660_s30  }
   0x9   :  { %1652 = dma.done.wait [#allocation3], 4096  }
   0xa   :  { %1653 = vsyncadd [#allocation3], 4294963200 }
   0xb   :  { %1654 = dma.done.wait [#allocation6], 4096  }
   0xc   :  { %1655 = vsyncadd [#allocation6], 4294963200  ;;  %v1662_v0 = vmov 0   ;;  %v56_v1 = vld [vmem:[%s2056_s0] sm:$0xff]  ;;  %v57_v2 = vld [vmem:[%s2056_s0 + $0x8] sm:$0xff]  ;;  %s1669_s14 = smov [#allocation7]  }
   0xd   :  { %1578 = vset.pattern.permute.xlu0 %v1662_v0  ;;  %v1579_v3 = vld [vmem:[%s2057_s1] ss:$0 sm:$0xff]  ;;  %v1663_v22 = vmov 683565275   ;;  %v1664_v24 = vmov 2475754826  }
   0xe   :  { %61 = vperm.xlu0 %1578, %v56_v1   ;;  %v1665_v26 = vmov 2131351028   ;;  %v1666_v31 = vmov 2102212464   ;;  %v1302_v34 = vld [vmem:[#allocation2 + $0x70] sm:$0xf] }
   0xf   :  { %v1515_v35 = vld [vmem:[#allocation2 + $0x74] sm:$0xf0]  ;;  %v1667_v36 = vmov 920167782   ;;  %v1668_v39 = vmov 1326507024  }
  0x10   :  { %v1303_v47 = vor.u32 %v1515_v35, %v1302_v34  ;;  %v1366_v58 = vld [vmem:[#allocation2 + $0xf0] sm:$0xf]  ;;  %v1531_v59 = vld [vmem:[#allocation2 + $0xf4] sm:$0xf0]  ;;  %v1514_v63 = vld [vmem:[#allocation2 + $0x74] sm:$0xf] }
  0x11   :  { %v1304_v1 = vld [vmem:[#allocation2 + $0x78] sm:$0xf0]  ;;  %s1218_s17 = sshll.u32 %s2062_s6, 4  ;;  %s1670_s18 = smov 256   ;;  %s1219_s17 = int_to_ptr.hbm [resolvable:$true] %s1218_s17 }
  0x12   :  { %892 = vmatpush.bf16.msra.mxu0 %v1303_v47  ;;  %s1671_s19 = smov 16  }
  0x16   :  { %66 = vperm.xlu0 %1578, %v57_v2   ;;  %v1530_v2 = vld [vmem:[#allocation2 + $0xf4] sm:$0xf] }
  0x80   :  { %v62_v4 = vpop.permute.xlu0 %61 }
  0x81   :  { %v1723_v5 = vmul.f32 %v1579_v3, %v62_v4 }
  0x83   :  { %v77_v6 = vand.u32 2139095040, %v1723_v5  ;;  %v74_v8 = vand.u32 2147483647, %v1723_v5 }
  0x85   :  { %v78_v7 = vshrl.u32 %v77_v6, 23  ;;  %v81_v13 = vand.u32 8388607, %v74_v8 }
  0x87   :  { %v1232_v9 = vadd.s32 4294967169, %v78_v7  ;;  %v82_v19 = vor.u32 8388608, %v81_v13 }
  0x88   :  { %v67_v10 = vpop.permute.xlu0 %66 }
  0x89   :  { %v84_v11 = vadd.s32 1, %v1232_v9  ;;  %v1727_v12 = vmul.f32 %v1579_v3, %v67_v10  ;;  %v1764_v61 = vshll.u32 %v82_v19, 8  ;;  %v1368_v3 = vld [vmem:[#allocation2 + $0xf8] sm:$0xf0]  ;;  %v1367_v9 = vor.u32 %v1531_v59, %v1366_v58  ;;  %v1294_v10 = vld [vmem:[#allocation2 + $0x60] sm:$0xf] }
  0x8b   :  { %vm85_vm0 = vcmp.gt.s32.totalorder %v84_v11, 0  ;;  %v2063_v15 = vand.u32 2147483647, %v1727_v12  ;;  %v232_v16 = vand.u32 2139095040, %v1727_v12  ;;  %v1778_v19 = vand.u32 65535, %v1764_v61  ;;  %906 = vmatpush.bf16.msra.mxu1 %v1367_v9 }
  0x8c   :  { %v86_v14 = vsel %vm85_vm0, %v84_v11, 0  ;;  %v1513_v11 = vld [vmem:[#allocation2 + $0x64] sm:$0xf0] }
  0x8d   :  { %v88_v17 = vand.u32 31, %v86_v14  ;;  %v1733_v18 = vshrl.u32 %v86_v14, 5  ;;  %v233_v21 = vshrl.u32 %v232_v16, 23  ;;  %v236_v28 = vand.u32 8388607, %v2063_v15 }
  0x8e   :  { %v1358_v16 = vld [vmem:[#allocation2 + $0xe0] sm:$0xf]  ;;  %v1320_v15 = vld [vmem:[#allocation2 + $0x98] sm:$0xf0] }
  0x8f   :  { %v89_v20 = vsub.s32 32, %v88_v17  ;;  %v91_v23 = vshll.u32 %v1663_v22, %v88_v17  ;;  %v94_v25 = vshll.u32 %v1664_v24, %v88_v17  ;;  %v97_v27 = vshll.u32 %v1665_v26, %v88_v17 }
  0x90   :  { %v100_v33 = vshll.u32 %v1666_v31, %v88_v17  ;;  %v103_v38 = vshll.u32 %v1667_v36, %v88_v17  ;;  %vm106_vm1 = vcmp.lt.s32.totalorder %v1733_v18, 1  ;;  %v1235_v44 = vadd.s32 4294967169, %v233_v21  ;;  %v1529_v17 = vld [vmem:[#allocation2 + $0xe4] sm:$0xf0] }
  0x91   :  { %v92_v29 = vshrl.u32 %v1664_v24, %v89_v20  ;;  %v95_v30 = vshrl.u32 %v1665_v26, %v89_v20  ;;  %v98_v32 = vshrl.u32 %v1666_v31, %v89_v20  ;;  %v101_v37 = vshrl.u32 %v1667_v36, %v89_v20 }
  0x92   :  { %v104_v40 = vshrl.u32 %v1668_v39, %v89_v20  ;;  %vm107_vm2 = vcmp.lt.s32.totalorder %v1733_v18, 2  ;;  %v90_v48 = vshrl.u32 %v1663_v22, %v89_v20  ;;  %vm108_vm3 = vcmp.lt.s32.totalorder %v1733_v18, 3 }
  0x93   :  { %v93_v41 = vor.u32 %v92_v29, %v91_v23  ;;  %v96_v42 = vor.u32 %v95_v30, %v94_v25  ;;  %v99_v43 = vor.u32 %v98_v32, %v97_v27  ;;  %v102_v45 = vor.u32 %v101_v37, %v100_v33 }
  0x94   :  { %v105_v46 = vor.u32 %v104_v40, %v103_v38  ;;  %vm109_vm4 = vcmp.lt.s32.totalorder %v1733_v18, 4  ;;  %v237_v52 = vor.u32 8388608, %v236_v28  ;;  %v239_v53 = vadd.s32 1, %v1235_v44 }
  0x95   :  { %v118_v49 = vsel %vm106_vm1, %v96_v42, %v99_v43  ;;  %v115_v50 = vsel %vm109_vm4, %v102_v45, 920167782  ;;  %v111_v54 = vsel %vm109_vm4, %v99_v43, 2102212464  ;;  %v114_v55 = vsel %vm106_vm1, %v93_v41, %v96_v42 }
  0x96   :  { %v119_v51 = vsel %vm109_vm4, %v105_v46, 1326507024  ;;  %v116_v56 = vsel %vm108_vm3, %v99_v43, %v115_v50  ;;  %vm240_vm5 = vcmp.gt.s32.totalorder %v239_v53, 0  ;;  %v110_v62 = vsel %vm106_vm1, %v90_v48, %v93_v41  ;;  %v1296_v50 = vld [vmem:[#allocation2 + $0x68] sm:$0xf0] }
  0x97   :  { %v120_v57 = vsel %vm108_vm3, %v102_v45, %v119_v51  ;;  %v112_v4 = vsel %vm108_vm3, %v96_v42, %v111_v54  ;;  %v1772_v6 = vsel %vm107_vm2, %v114_v55, %v116_v56  ;;  %v241_v7 = vsel %vm240_vm5, %v239_v53, 0  ;;  %v1360_v54 = vld [vmem:[#allocation2 + $0xe8] sm:$0xf0] }
  0x98   :  { %v1762_v60 = vsel %vm107_vm2, %v118_v49, %v120_v57  ;;  %v1775_v14 = vshll.u32 %v237_v52, 8  ;;  %v1781_v20 = vshrl.u32 %v1764_v61, 16  ;;  %v1785_v21 = vsel %vm107_vm2, %v110_v62, %v112_v4  ;;  %v1511_v57 = vld [vmem:[#allocation2 + $0x54] sm:$0xf0] }
  0x99   :  { %v126_v13 = vshrl.u32 %v1762_v60, 16  ;;  %v125_v23 = vand.u32 65535, %v1762_v60  ;;  %v147_v25 = vand.u32 65535, %v1772_v6  ;;  %v243_v27 = vand.u32 31, %v241_v7 }
  0x9a   :  { %v1307_v28 = vor.u32 %v1514_v63, %v1304_v1  ;;  %v1371_v29 = vor.u32 %v1530_v2, %v1368_v3  ;;  %v1295_v30 = vor.u32 %v1513_v11, %v1294_v10  ;;  %v1359_v32 = vor.u32 %v1529_v17, %v1358_v16  ;;  %v1350_v63 = vld [vmem:[#allocation2 + $0xd0] sm:$0xf]  ;;  %v1527_v1 = vld [vmem:[#allocation2 + $0xd4] sm:$0xf0]  ;;  %v1510_v2 = vld [vmem:[#allocation2 + $0x54] sm:$0xf] }
  0x9b   :  { %v1792_v33 = vmul.u32 %v126_v13, %v1778_v19  ;;  %v148_v34 = vshrl.u32 %v1772_v6, 16  ;;  %v1795_v35 = vsub.s32 32, %v243_v27  ;;  %v1798_v18 = vand.u32 65535, %v1775_v14  ;;  %v1288_v3 = vld [vmem:[#allocation2 + $0x58] sm:$0xf0] }
  0x9c   :  { %v1800_v37 = vshrl.u32 %v241_v7, 5  ;;  %v246_v38 = vshll.u32 %v1663_v22, %v243_v27  ;;  %v249_v40 = vshll.u32 %v1664_v24, %v243_v27  ;;  %v1805_v41 = vshrl.u32 %v1775_v14, 16  ;;  %920 = vmatpush.bf16.msra.mxu2 %v1307_v28  ;;  %934 = vmatpush.bf16.msra.mxu3 %v1371_v29  ;;  %v1526_v17 = vld [vmem:[#allocation2 + $0xd4] sm:$0xf]  ;;  %v1505_v6 = vld [vmem:[#allocation2 + $0x24] sm:$0xf0] }
  0x9d   :  { %v247_v42 = vshrl.u32 %v1664_v24, %v1795_v35  ;;  %v250_v43 = vshrl.u32 %v1665_v26, %v1795_v35  ;;  %v252_v44 = vshll.u32 %v1665_v26, %v243_v27  ;;  %v255_v45 = vshll.u32 %v1666_v31, %v243_v27  ;;  %893 = vmatpush.bf16.msra.mxu0 %v1295_v30  ;;  %v1512_v24 = vld [vmem:[#allocation2 + $0x64] sm:$0xf] }
  0x9e   :  { %v253_v46 = vshrl.u32 %v1666_v31, %v1795_v35  ;;  %v256_v47 = vshrl.u32 %v1667_v36, %v1795_v35  ;;  %v258_v48 = vshll.u32 %v1667_v36, %v243_v27  ;;  %v259_v49 = vshrl.u32 %v1668_v39, %v1795_v35  ;;  %907 = vmatpush.bf16.msra.mxu1 %v1359_v32  ;;  %v1528_v31 = vld [vmem:[#allocation2 + $0xe4] sm:$0xf]  ;;  %v1286_v39 = vld [vmem:[#allocation2 + $0x50] sm:$0xf]  ;;  %v1278_v32 = vld [vmem:[#allocation2 + $0x40] sm:$0xf] }
  0x9f   :  { %v127_v51 = vmul.u32 %v125_v23, %v1778_v19  ;;  %v131_v26 = vshll.u32 %v1792_v33, 16  ;;  %v1822_v52 = vor.u32 %v247_v42, %v246_v38  ;;  %v1824_v53 = vor.u32 %v250_v43, %v249_v40  ;;  %v1509_v38 = vld [vmem:[#allocation2 + $0x44] sm:$0xf0]  ;;  %v1342_v40 = vld [vmem:[#allocation2 + $0xc0] sm:$0xf] }
  0xa0   :  { %v1826_v55 = vor.u32 %v253_v46, %v252_v44  ;;  %v257_v56 = vor.u32 %v256_v47, %v255_v45  ;;  %v260_v36 = vor.u32 %v259_v49, %v258_v48  ;;  %vm261_vm6 = vcmp.lt.s32.totalorder %v1800_v37, 1  ;;  %v1525_v42 = vld [vmem:[#allocation2 + $0xc4] sm:$0xf0]  ;;  %v1508_v47 = vld [vmem:[#allocation2 + $0x44] sm:$0xf] }
  0xa1   :  { %v1830_v58 = vmul.u32 %v125_v23, %v1781_v20  ;;  %vm264_vm7 = vcmp.lt.s32.totalorder %v1800_v37, 4  ;;  %v269_v59 = vsel %vm261_vm6, %v1822_v52, %v1824_v53  ;;  %v1299_v62 = vor.u32 %v1512_v24, %v1296_v50  ;;  %v1352_v23 = vld [vmem:[#allocation2 + $0xd8] sm:$0xf0]  ;;  %v1280_v48 = vld [vmem:[#allocation2 + $0x48] sm:$0xf0] }
  0xa2   :  { %vm263_vm8 = vcmp.lt.s32.totalorder %v1800_v37, 3  ;;  %v270_v4 = vsel %vm264_vm7, %v257_v56, 920167782  ;;  %v273_v7 = vsel %vm261_vm6, %v1824_v53, %v1826_v55  ;;  %v274_v9 = vsel %vm264_vm7, %v260_v36, 1326507024 }
  0xa3   :  { %vm262_vm9 = vcmp.lt.s32.totalorder %v1800_v37, 2  ;;  %v271_v10 = vsel %vm263_vm8, %v1826_v55, %v270_v4  ;;  %v275_v11 = vsel %vm263_vm8, %v257_v56, %v274_v9  ;;  %921 = vmatpush.bf16.msra.mxu2 %v1299_v62  ;;  %v1363_v16 = vor.u32 %v1528_v31, %v1360_v54  ;;  %v1524_v49 = vld [vmem:[#allocation2 + $0xc4] sm:$0xf]  ;;  %v1344_v31 = vld [vmem:[#allocation2 + $0xc8] sm:$0xf0] }
  0xa4   :  { %vm1852_vm10 = vc.u32 %v127_v51, %v131_v26  ;;  %v1858_v28 = vsel %vm262_vm9, %v269_v59, %v271_v10  ;;  %v276_v29 = vsel %vm262_vm9, %v273_v7, %v275_v11  ;;  %v1287_v30 = vor.u32 %v1511_v57, %v1286_v39  ;;  %v1875_v54 = vld [vmem:[#allocation2 + $0x30] sm:$0xf]  ;;  %v1507_v56 = vld [vmem:[#allocation2 + $0x34] sm:$0xf0]  ;;  %v1272_v4 = vld [vmem:[#allocation2 + $0x38] sm:$0xf0] }
  0xa5   :  { %v130_v43 = vmul.u32 %v126_v13, %v1781_v20  ;;  %v1868_v44 = vmul.u32 %v147_v25, %v1778_v19  ;;  %v280_v45 = vand.u32 65535, %v276_v29  ;;  %v281_v46 = vshrl.u32 %v276_v29, 16  ;;  %935 = vmatpush.bf16.msra.mxu3 %v1363_v16  ;;  %v1334_v59 = vld [vmem:[#allocation2 + $0xb0] sm:$0xf]  ;;  %v1523_v62 = vld [vmem:[#allocation2 + $0xb4] sm:$0xf0] }
  0xa6   :  { %v1873_v24 = vmul.u32 %v148_v34, %v1778_v19  ;;  %894 = vmatpush.bf16.msra.mxu0 %v1287_v30  ;;  %v1351_v50 = vor.u32 %v1527_v1, %v1350_v63  ;;  %v1291_v60 = vor.u32 %v1510_v2, %v1288_v3  ;;  %v1355_v13 = vor.u32 %v1526_v17, %v1352_v23  ;;  %v1522_v7 = vld [vmem:[#allocation2 + $0xb4] sm:$0xf]  ;;  %v1336_v9 = vld [vmem:[#allocation2 + $0xb8] sm:$0xf0]  ;;  %v1900_v16 = vld [vmem:[#allocation2 + $0x20] sm:$0xf] }
  0xa7   :  { %v136_v36 = vsel %vm1852_vm10, 1, %v1662_v0  ;;  %v1883_v39 = vmul.u32 %v147_v25, %v1781_v20  ;;  %v1886_v19 = vmul.u32 %v281_v46, %v1798_v18  ;;  %v302_v57 = vand.u32 65535, %v1858_v28  ;;  %v1506_v25 = vld [vmem:[#allocation2 + $0x34] sm:$0xf]  ;;  %v1907_v29 = vld [vmem:[#allocation2 + $0x24] sm:$0xf] }
  0xa8   :  { %v133_v63 = vshll.u32 %v1830_v58, 16  ;;  %v1890_v1 = vadd.s32 %v131_v26, %v127_v51  ;;  %v1895_v2 = vmul.u32 %v148_v34, %v1781_v20  ;;  %v303_v3 = vshrl.u32 %v1858_v28, 16  ;;  %908 = vmatpush.bf16.msra.mxu1 %v1351_v50  ;;  %922 = vmatpush.bf16.msra.mxu2 %v1291_v60  ;;  %v1902_v20 = vld [vmem:[#allocation2 + $0xa0] sm:$0xf]  ;;  %v1521_v28 = vld [vmem:[#allocation2 + $0xa4] sm:$0xf0] }
  0xa9   :  { %v282_v10 = vmul.u32 %v280_v45, %v1798_v18  ;;  %v286_v11 = vshll.u32 %v1886_v19, 16  ;;  %936 = vmatpush.bf16.msra.mxu3 %v1355_v13  ;;  %v1279_v51 = vor.u32 %v1509_v38, %v1278_v32  ;;  %v1343_v26 = vor.u32 %v1525_v42, %v1342_v40  ;;  %v1909_v30 = vld [vmem:[#allocation2 + $0x28] sm:$0xf0]  ;;  %v1520_v40 = vld [vmem:[#allocation2 + $0xa4] sm:$0xf] }
  0xaa   :  { %v138_v34 = vadd.s32 %v136_v36, %v130_v43  ;;  %v1905_v17 = vmul.u32 %v280_v45, %v1805_v41  ;;  %v1283_v23 = vor.u32 %v1508_v47, %v1280_v48  ;;  %v1347_v27 = vor.u32 %v1524_v49, %v1344_v31  ;;  %v1328_v42 = vld [vmem:[#allocation2 + $0xa8] sm:$0xf0]  ;;  %v1916_v43 = vld [vmem:[#allocation2 + $0x10] sm:$0xf]  ;;  %v1925_v49 = vld [vmem:[#allocation2 + $0x14] sm:$0xf0] }
  0xab   :  { %v285_v50 = vmul.u32 %v281_v46, %v1805_v41  ;;  %vm290_vm11 = vc.u32 %v282_v10, %v286_v11  ;;  %v1913_v32 = vmul.u32 %v302_v57, %v1798_v18  ;;  %895 = vmatpush.bf16.msra.mxu0 %v1279_v51  ;;  %v1271_v38 = vor.u32 %v1507_v56, %v1875_v54  ;;  %v1927_v60 = vld [vmem:[#allocation2 + $0x90] sm:$0xf]  ;;  %v1519_v56 = vld [vmem:[#allocation2 + $0x94] sm:$0xf0]  ;;  %v1932_v36 = vld [vmem:[#allocation2 + $0x14] sm:$0xf] }
  0xac   :  { %v291_v45 = vsel %vm290_vm11, 1, %v1662_v0  ;;  %v1920_v47 = vmul.u32 %v303_v3, %v1798_v18  ;;  %v1923_v48 = vmul.u32 %v302_v57, %v1805_v41  ;;  %909 = vmatpush.bf16.msra.mxu1 %v1343_v26  ;;  %v1335_v46 = vor.u32 %v1523_v62, %v1334_v59  ;;  %923 = vmatpush.bf16.msra.mxu2 %v1283_v23  ;;  %v1934_v18 = vld [vmem:[#allocation2 + $0x18] sm:$0xf0]  ;;  %v1518_v26 = vld [vmem:[#allocation2 + $0x94] sm:$0xf] }
  0xad   :  { %v1930_v13 = vmul.u32 %v303_v3, %v1805_v41  ;;  %937 = vmatpush.bf16.msra.mxu3 %v1347_v27  ;;  %v1275_v31 = vor.u32 %v1506_v25, %v1272_v4  ;;  %v1339_v54 = vor.u32 %v1522_v7, %v1336_v9  ;;  %v288_v57 = vshll.u32 %v1905_v17, 16  ;;  %v1246_v9 = vld [vmem:[#allocation2] sm:$0xf]  ;;  %v1517_v27 = vld [vmem:[#allocation2 + $0x84] sm:$0xf0] }
  0xae   :  { %v292_v51 = vadd.s32 %v286_v11, %v282_v10  ;;  %v1263_v59 = vor.u32 %v1505_v6, %v1900_v16  ;;  %v1327_v62 = vor.u32 %v1521_v28, %v1902_v20  ;;  %v293_v41 = vadd.s32 %v291_v45, %v285_v50  ;;  %v1501_v10 = vld [vmem:[#allocation2 + $0x4] sm:$0xf0]  ;;  %v1310_v23 = vld [vmem:[#allocation2 + $0x80] sm:$0xf] }
  0xaf   :  { %896 = vmatpush.bf16.msra.mxu0 %v1271_v38  ;;  %v1267_v3 = vor.u32 %v1907_v29, %v1909_v30  ;;  %v1331_v25 = vor.u32 %v1520_v40, %v1328_v42  ;;  %v1255_v4 = vor.u32 %v1925_v49, %v1916_v43  ;;  %v1319_v7 = vor.u32 %v1519_v56, %v1927_v60  ;;  %v1500_v40 = vld [vmem:[#allocation2 + $0x4] sm:$0xf]  ;;  %v1248_v42 = vld [vmem:[#allocation2 + $0x8] sm:$0xf0] }
  0xb0   :  { %910 = vmatpush.bf16.msra.mxu1 %v1335_v46  ;;  %v132_v11 = vshrl.u32 %v1792_v33, 16  ;;  %vm139_vm12 = vc.u32 %v1890_v1, %v133_v63  ;;  %v153_v16 = vshll.u32 %v1873_v24, 16  ;;  %924 = vmatpush.bf16.msra.mxu2 %v1275_v31  ;;  %v1259_v6 = vor.u32 %v1932_v36, %v1934_v18  ;;  %v1516_v60 = vld [vmem:[#allocation2 + $0x84] sm:$0xf]  ;;  %v1312_v31 = vld [vmem:[#allocation2 + $0x88] sm:$0xf0] }
  0xb1   :  { %938 = vmatpush.bf16.msra.mxu3 %v1339_v54  ;;  %v1323_v20 = vor.u32 %v1518_v26, %v1320_v15  ;;  %v140_v28 = vsel %vm139_vm12, 1, %v1662_v0  ;;  %v155_v29 = vshll.u32 %v1883_v39, 16  ;;  %vm294_vm14 = vc.u32 %v292_v51, %v288_v57 }
  0xb2   :  { %v142_v30 = vadd.s32 %v140_v28, %v138_v34  ;;  %vm157_vm13 = vc.u32 %v1868_v44, %v153_v16  ;;  %v159_v33 = vadd.s32 %v153_v16, %v1868_v44  ;;  %v1247_v63 = vor.u32 %v1501_v10, %v1246_v9 }
  0xb3   :  { %897 = vmatpush.bf16.msra.mxu0 %v1263_v59  ;;  %v158_v1 = vsel %vm157_vm13, 1, %v1662_v0  ;;  %v295_v50 = vsel %vm294_vm14, 1, %v1662_v0  ;;  %v308_v15 = vshll.u32 %v1920_v47, 16  ;;  %v1311_v38 = vor.u32 %v1517_v27, %v1310_v23 }
  0xb4   :  { %911 = vmatpush.bf16.msra.mxu1 %v1327_v62  ;;  %v143_v43 = vadd.s32 %v142_v30, %v132_v11  ;;  %v160_v34 = vadd.s32 %v158_v1, %v1895_v2  ;;  %vm161_vm15 = vc.u32 %v159_v33, %v155_v29  ;;  %925 = vmatpush.bf16.msra.mxu2 %v1267_v3  ;;  %v134_v44 = vshrl.u32 %v1830_v58, 16 }
  0xb5   :  { %939 = vmatpush.bf16.msra.mxu3 %v1331_v25  ;;  %v154_v45 = vshrl.u32 %v1873_v24, 16  ;;  %v162_v46 = vsel %vm161_vm15, 1, %v1662_v0  ;;  %v297_v49 = vadd.s32 %v295_v50, %v293_v41  ;;  %v287_v56 = vshrl.u32 %v1886_v19, 16 }
  0xb6   :  { %v164_v54 = vadd.s32 %v162_v46, %v160_v34  ;;  %vm312_vm0 = vc.u32 %v1913_v32, %v308_v15  ;;  %v314_v36 = vadd.s32 %v308_v15, %v1913_v32  ;;  %v1251_v2 = vor.u32 %v1500_v40, %v1248_v42 }
  0xb7   :  { %898 = vmatpush.bf16.msra.mxu0 %v1255_v4  ;;  %v144_v18 = vadd.s32 %v143_v43, %v134_v44  ;;  %v310_v57 = vshll.u32 %v1923_v48, 16  ;;  %v313_v58 = vsel %vm312_vm0, 1, %v1662_v0  ;;  %v156_v24 = vshrl.u32 %v1883_v39, 16 }
  0xb8   :  { %912 = vmatpush.bf16.msra.mxu1 %v1319_v7  ;;  %v165_v51 = vadd.s32 %v164_v54, %v154_v45  ;;  %v298_v59 = vadd.s32 %v297_v49, %v287_v56  ;;  %v315_v62 = vadd.s32 %v313_v58, %v1930_v13  ;;  %v266_v19 = vsel %vm264_vm7, %v1826_v55, 2102212464  ;;  %926 = vmatpush.bf16.msra.mxu2 %v1259_v6 }
  0xb9   :  { %940 = vmatpush.bf16.msra.mxu3 %v1323_v20  ;;  %v1315_v32 = vor.u32 %v1516_v60, %v1312_v31  ;;  %v163_v26 = vadd.s32 %v159_v33, %v155_v29  ;;  %vm316_vm1 = vc.u32 %v314_v36, %v310_v57  ;;  %v245_v41 = vshrl.u32 %v1663_v22, %v1795_v35 }
  0xba   :  { %v166_v3 = vadd.s32 %v165_v51, %v156_v24  ;;  %v289_v25 = vshrl.u32 %v1905_v17, 16  ;;  %v317_v39 = vsel %vm316_vm1, 1, %v1662_v0  ;;  %v309_v13 = vshrl.u32 %v1920_v47, 16 }
  0xbb   :  { %899 = vmatpush.bf16.msra.mxu0 %v1247_v63  ;;  %vm169_vm2 = vc.u32 %v144_v18, %v163_v26  ;;  %v319_v4 = vadd.s32 %v317_v39, %v315_v62  ;;  %v265_v55 = vsel %vm261_vm6, %v245_v41, %v1822_v52  ;;  %v267_v7 = vsel %vm263_vm8, %v1824_v53, %v266_v19 }
  0xbc   :  { %913 = vmatpush.bf16.msra.mxu1 %v1311_v38  ;;  %v170_v22 = vadd.s32 1, %v166_v3  ;;  %v299_v35 = vadd.s32 %v298_v59, %v289_v25  ;;  %v167_v17 = vmul.u32 %v1764_v61, %v1785_v21  ;;  %927 = vmatpush.bf16.msra.mxu2 %v1251_v2  ;;  %v311_v0 = vshrl.u32 %v1923_v48, 16 }
  0xbd   :  { %941 = vmatpush.bf16.msra.mxu3 %v1315_v32  ;;  %v320_v47 = vadd.s32 %v319_v4, %v309_v13  ;;  %v318_v10 = vadd.s32 %v314_v36, %v310_v57  ;;  %v268_v52 = vsel %vm262_vm9, %v265_v55, %v267_v7  ;;  %v168_v42 = vadd.s32 %v163_v26, %v144_v18  ;;  %v1430_v7 = vld [vmem:[#allocation5 + $0x70] sm:$0xf] }
  0xbe   :  { %v171_v9 = vsel %vm169_vm2, %v170_v22, %v166_v3  ;;  %v322_v20 = vmul.u32 %v1775_v14, %v268_v52  ;;  %vm76_vm8 = vcmp.lt.s32.totalorder %v1723_v5, 0  ;;  %vm1998_vm9 = vcmp.le.f32.partialorder %v74_v8, 0.7853982  ;;  %v1547_v22 = vld [vmem:[#allocation5 + $0x74] sm:$0xf0] }
  0xbf   :  { %v172_v11 = vadd.s32 %v171_v9, %v167_v17  ;;  %v321_v16 = vadd.s32 %v320_v47, %v311_v0  ;;  %vm324_vm3 = vc.u32 %v299_v35, %v318_v10  ;;  %v323_v56 = vadd.s32 %v318_v10, %v299_v35  ;;  %v1546_v17 = vld [vmem:[#allocation5 + $0x74] sm:$0xf]  ;;  %v1432_v0 = vld [vmem:[#allocation5 + $0x78] sm:$0xf0]  ;;  %v1422_v47 = vld [vmem:[#allocation5 + $0x60] sm:$0xf] }
  0xc0   :  { %vm231_vm10 = vcmp.lt.s32.totalorder %v1727_v12, 0  ;;  %v2068_v39 = vand.u32 2147483647, %v1727_v12  ;;  %v1431_v35 = vor.u32 %v1547_v22, %v1430_v7  ;;  %v1435_v52 = vor.u32 %v1546_v17, %v1432_v0 }
  0xc1   :  { %v173_v53 = vadd.s32 536870912, %v172_v11  ;;  %v325_v6 = vadd.s32 1, %v321_v16 }
  0xc2   :  { %vm2006_vm11 = vcmp.le.f32.partialorder %v2068_v39, 0.7853982  ;;  %1152 = vmatpush.bf16.msrb.mxu0 %v1431_v35  ;;  %1180 = vmatpush.bf16.msrb.mxu2 %v1435_v52 }
  0xc3   :  { %v1989_v23 = vshrl.u32 %v173_v53, 30  ;;  %v326_v61 = vsel %vm324_vm3, %v325_v6, %v321_v16  ;;  %v1544_v16 = vld [vmem:[#allocation5 + $0x64] sm:$0xf]  ;;  %v1424_v53 = vld [vmem:[#allocation5 + $0x68] sm:$0xf0] }
  0xc4   :  { %v327_v21 = vadd.s32 %v326_v61, %v322_v20  ;;  %v1494_v61 = vld [vmem:[#allocation5 + $0xf0] sm:$0xf] }
  0xc5   :  { %v175_v27 = vshll.u32 %v1989_v23, 30  ;;  %v198_v25 = vsub.s32 4, %v1989_v23 }
  0xc6   :  { %v328_v48 = vadd.s32 536870912, %v327_v21 }
  0xc7   :  { %v176_v28 = vsub.s32 %v172_v11, %v175_v27  ;;  %v1545_v11 = vld [vmem:[#allocation5 + $0x64] sm:$0xf0]  ;;  %v1562_v27 = vld [vmem:[#allocation5 + $0xf4] sm:$0xf] }
  0xc8   :  { %v1992_v29 = vshrl.u32 %v328_v48, 30  ;;  %v1423_v20 = vor.u32 %v1545_v11, %v1422_v47 }
  0xc9   :  { %vm177_vm4 = vcmp.lt.s32.totalorder %v176_v28, 0  ;;  %v178_v37 = vsub.s32 0, %v176_v28 }
  0xca   :  { %v330_v30 = vshll.u32 %v1992_v29, 30  ;;  %1153 = vmatpush.bf16.msrb.mxu0 %v1423_v20 }
  0xcb   :  { %v179_v33 = vsel %vm177_vm4, %v178_v37, %v176_v28  ;;  %v1427_v37 = vor.u32 %v1544_v16, %v1424_v53 }
  0xcc   :  { %v180_v63 = vclz %v179_v33  ;;  %v331_v1 = vsub.s32 %v327_v21, %v330_v30  ;;  %v1563_v21 = vld [vmem:[#allocation5 + $0xf4] sm:$0xf0]  ;;  %v1496_v33 = vld [vmem:[#allocation5 + $0xf8] sm:$0xf0] }
  0xcd   :  { %v1495_v30 = vor.u32 %v1563_v21, %v1494_v61  ;;  %1181 = vmatpush.bf16.msrb.mxu2 %v1427_v37 }
  0xce   :  { %v1233_v50 = vadd.s32 4294967294, %v180_v63  ;;  %vm332_vm5 = vcmp.lt.s32.totalorder %v331_v1, 0  ;;  %v333_v14 = vsub.s32 0, %v331_v1  ;;  %v1414_v63 = vld [vmem:[#allocation5 + $0x50] sm:$0xf] }
  0xcf   :  { %1166 = vmatpush.bf16.msrb.mxu1 %v1495_v30 }
  0xd0   :  { %vm1234_vm6 = vcmp.lt.s32.totalorder %v1233_v50, 0  ;;  %v334_v15 = vsel %vm332_vm5, %v333_v14, %v331_v1  ;;  %v1499_v14 = vor.u32 %v1562_v27, %v1496_v33 }
  0xd1   :  { %v183_v38 = vsel %vm1234_vm6, 0, %v1233_v50  ;;  %v335_v40 = vclz %v334_v15  ;;  %v1543_v15 = vld [vmem:[#allocation5 + $0x54] sm:$0xf0] }
  0xd2   :  { %v184_v43 = vsub.s32 32, %v183_v38  ;;  %v188_v34 = vsub.s32 4294967266, %v183_v38  ;;  %v185_v45 = vshll.u32 %v176_v28, %v183_v38  ;;  %v353_v28 = vsub.s32 4, %v1992_v29  ;;  %1194 = vmatpush.bf16.msrb.mxu3 %v1499_v14 }
  0xd3   :  { %v1236_v44 = vadd.s32 4294967294, %v335_v40  ;;  %v199_v38 = vsel %vm76_vm8, %v198_v25, %v1989_v23 }
  0xd4   :  { %v186_v46 = vshrl.u32 %v168_v42, %v184_v43  ;;  %v189_v49 = vadd.s32 127, %v188_v34  ;;  %v1542_v42 = vld [vmem:[#allocation5 + $0x54] sm:$0xf]  ;;  %v1416_v43 = vld [vmem:[#allocation5 + $0x58] sm:$0xf0] }
  0xd5   :  { %vm1237_vm7 = vcmp.lt.s32.totalorder %v1236_v44, 0  ;;  %v1486_v34 = vld [vmem:[#allocation5 + $0xe0] sm:$0xf] }
  0xd6   :  { %v187_v60 = vor.u32 %v186_v46, %v185_v45  ;;  %v190_v31 = vshll.u32 %v189_v49, 23  ;;  %v338_v54 = vsel %vm1237_vm7, 0, %v1236_v44  ;;  %v1415_v49 = vor.u32 %v1543_v15, %v1414_v63 }
  0xd7   :  { %v339_v36 = vsub.s32 32, %v338_v54  ;;  %v343_v2 = vsub.s32 4294967266, %v338_v54  ;;  %v340_v58 = vshll.u32 %v331_v1, %v338_v54 }
  0xd8   :  { %v191_v57 = vor.u32 4788187, %v190_v31  ;;  %v194_v62 = vcvt.s32.f32 %v187_v60  ;;  %v1561_v60 = vld [vmem:[#allocation5 + $0xe4] sm:$0xf0]  ;;  %v1419_v31 = vor.u32 %v1542_v42, %v1416_v43  ;;  %1154 = vmatpush.bf16.msrb.mxu0 %v1415_v49 }
  0xd9   :  { %v341_v24 = vshrl.u32 %v323_v56, %v339_v36  ;;  %v344_v51 = vadd.s32 127, %v343_v2  ;;  %v1487_v54 = vor.u32 %v1561_v60, %v1486_v34  ;;  %v1560_v56 = vld [vmem:[#allocation5 + $0xe4] sm:$0xf]  ;;  %v1488_v36 = vld [vmem:[#allocation5 + $0xe8] sm:$0xf0] }
  0xda   :  { %v192_v59 = vand.u32 2147483647, %v191_v57  ;;  %v1406_v2 = vld [vmem:[#allocation5 + $0x40] sm:$0xf]  ;;  %1182 = vmatpush.bf16.msrb.mxu2 %v1419_v31 }
  0xdb   :  { %v342_v18 = vor.u32 %v341_v24, %v340_v58  ;;  %v345_v19 = vshll.u32 %v344_v51, 23  ;;  %v354_v24 = vsel %vm231_vm10, %v353_v28, %v1992_v29  ;;  %v1491_v51 = vor.u32 %v1560_v56, %v1488_v36  ;;  %1167 = vmatpush.bf16.msrb.mxu1 %v1487_v54  ;;  %v1478_v56 = vld [vmem:[#allocation5 + $0xd0] sm:$0xf]  ;;  %v1559_v36 = vld [vmem:[#allocation5 + $0xd4] sm:$0xf0] }
  0xdc   :  { %v195_v32 = vmul.f32 %v194_v62, %v192_v59  ;;  %v1541_v59 = vld [vmem:[#allocation5 + $0x44] sm:$0xf0]  ;;  %v1540_v62 = vld [vmem:[#allocation5 + $0x44] sm:$0xf] }
  0xdd   :  { %v346_v41 = vor.u32 4788187, %v345_v19  ;;  %v349_v55 = vcvt.s32.f32 %v342_v18  ;;  %v1408_v18 = vld [vmem:[#allocation5 + $0x48] sm:$0xf0]  ;;  %v201_v19 = vsel %vm1998_vm9, 0, %v199_v38  ;;  %1195 = vmatpush.bf16.msrb.mxu3 %v1491_v51  ;;  %v1407_v39 = vor.u32 %v1541_v59, %v1406_v2 }
  0xde   :  { %v196_v3 = vxor.u32 2147483648, %v195_v32  ;;  %v1411_v7 = vor.u32 %v1540_v62, %v1408_v18  ;;  %v218_v35 = vadd.s32 3, %v201_v19  ;;  %v528_v16 = vand.u32 3, %v201_v19  ;;  %v1558_v2 = vld [vmem:[#allocation5 + $0xd4] sm:$0xf] }
  0xdf   :  { %v347_v4 = vand.u32 2147483647, %v346_v41  ;;  %1155 = vmatpush.bf16.msrb.mxu0 %v1407_v39  ;;  %v1538_v51 = vld [vmem:[#allocation5 + $0x34] sm:$0xf]  ;;  %v1400_v62 = vld [vmem:[#allocation5 + $0x38] sm:$0xf0] }
  0xe0   :  { %v197_v8 = vsel %vm76_vm8, %v196_v3, %v195_v32  ;;  %1183 = vmatpush.bf16.msrb.mxu2 %v1411_v7  ;;  %v219_v53 = vand.u32 3, %v218_v35  ;;  %vm529_vm12 = vcmp.lt.s32.totalorder %v528_v16, 2  ;;  %vm530_vm15 = vcmp.eq.s32.totalorder %v528_v16, 0  ;;  %v1470_v19 = vld [vmem:[#allocation5 + $0xc0] sm:$0xf] }
  0xe1   :  { %v2015_v9 = vsel %vm1998_vm9, %v1723_v5, %v197_v8  ;;  %v350_v10 = vmul.f32 %v349_v55, %v347_v4  ;;  %v356_v4 = vsel %vm2006_vm11, 0, %v354_v24  ;;  %vm533_vm0 = vcmp.eq.s32.totalorder %v528_v16, 2  ;;  %v1539_v24 = vld [vmem:[#allocation5 + $0x34] sm:$0xf0]  ;;  %v1462_v35 = vld [vmem:[#allocation5 + $0xb0] sm:$0xf] }
  0xe2   :  { %v202_v6 = vmul.f32 %v2015_v9, %v2015_v9  ;;  %v373_v47 = vadd.s32 3, %v356_v4  ;;  %vm220_vm13 = vcmp.lt.s32.totalorder %v219_v53, 2  ;;  %vm221_vm14 = vcmp.eq.s32.totalorder %v219_v53, 0  ;;  %v1534_v16 = vld [vmem:[#allocation5 + $0x14] sm:$0xf] }
  0xe3   :  { %v351_v48 = vxor.u32 2147483648, %v350_v10  ;;  %vm224_vm1 = vcmp.eq.s32.totalorder %v219_v53, 2  ;;  %vm217_vm8 = vweird.f32 %v1723_v5  ;;  %vm372_vm9 = vweird.f32 %v1727_v12  ;;  %v1384_v53 = vld [vmem:[#allocation5 + $0x18] sm:$0xf0] }
  0xe4   :  { %v203_v1 = vmul.f32 -0.001358992, %v202_v6  ;;  %v210_v50 = vmul.f32 -0.00019511016, %v202_v6  ;;  %v374_v27 = vand.u32 3, %v373_v47  ;;  %v1479_v5 = vor.u32 %v1559_v36, %v1478_v56 }
  0xe5   :  { %v352_v40 = vsel %vm231_vm10, %v351_v48, %v350_v10  ;;  %v682_v48 = vand.u32 3, %v356_v4  ;;  %v1403_v18 = vor.u32 %v1538_v51, %v1400_v62  ;;  %v1390_v4 = vld [vmem:[#allocation5 + $0x20] sm:$0xf]  ;;  %v1464_v47 = vld [vmem:[#allocation5 + $0xb8] sm:$0xf0] }
  0xe6   :  { %v204_v44 = vadd.f32 0.041655596, %v203_v1  ;;  %v211_v45 = vadd.f32 0.008332121, %v210_v50  ;;  %v2028_v46 = vsel %vm2006_vm11, %v1727_v12, %v352_v40  ;;  %vm375_vm2 = vcmp.lt.s32.totalorder %v374_v27, 2  ;;  %1168 = vmatpush.bf16.msrb.mxu1 %v1479_v5 }
  0xe7   :  { %v357_v23 = vmul.f32 %v2028_v46, %v2028_v46  ;;  %vm683_vm3 = vcmp.lt.s32.totalorder %v682_v48, 2  ;;  %vm684_vm4 = vcmp.eq.s32.totalorder %v682_v48, 0  ;;  %vm376_vm5 = vcmp.eq.s32.totalorder %v374_v27, 0  ;;  %1184 = vmatpush.bf16.msrb.mxu2 %v1403_v18 }
  0xe8   :  { %v205_v57 = vmul.f32 %v204_v44, %v202_v6  ;;  %v212_v58 = vmul.f32 %v211_v45, %v202_v6  ;;  %vm379_vm6 = vcmp.eq.s32.totalorder %v374_v27, 2  ;;  %vm687_vm7 = vcmp.eq.s32.totalorder %v682_v48, 2  ;;  %v1552_v27 = vld [vmem:[#allocation5 + $0xa4] sm:$0xf] }
  0xe9   :  { %v358_v32 = vmul.f32 -0.001358992, %v357_v23  ;;  %v365_v41 = vmul.f32 -0.00019511016, %v357_v23 }
  0xea   :  { %v206_v3 = vadd.f32 -0.4999988, %v205_v57  ;;  %v213_v25 = vadd.f32 -0.16666654, %v212_v58  ;;  %v1480_v57 = vld [vmem:[#allocation5 + $0xd8] sm:$0xf0] }
  0xeb   :  { %v359_v55 = vadd.f32 0.041655596, %v358_v32  ;;  %v366_v29 = vadd.f32 0.008332121, %v365_v41  ;;  %v1483_v12 = vor.u32 %v1558_v2, %v1480_v57  ;;  %v1398_v58 = vld [vmem:[#allocation5 + $0x30] sm:$0xf] }
  0xec   :  { %v207_v22 = vmul.f32 %v206_v3, %v202_v6  ;;  %v214_v8 = vmul.f32 %v213_v25, %v202_v6  ;;  %v1399_v59 = vor.u32 %v1539_v24, %v1398_v58  ;;  %v1557_v32 = vld [vmem:[#allocation5 + $0xc4] sm:$0xf0]  ;;  %v1556_v41 = vld [vmem:[#allocation5 + $0xc4] sm:$0xf]  ;;  %v1472_v25 = vld [vmem:[#allocation5 + $0xc8] sm:$0xf0] }
  0xed   :  { %v360_v26 = vmul.f32 %v359_v55, %v357_v23  ;;  %v367_v17 = vmul.f32 %v366_v29, %v357_v23  ;;  %1196 = vmatpush.bf16.msrb.mxu3 %v1483_v12  ;;  %v1471_v3 = vor.u32 %v1557_v32, %v1470_v19  ;;  %v1475_v39 = vor.u32 %v1556_v41, %v1472_v25  ;;  %v1537_v55 = vld [vmem:[#allocation5 + $0x24] sm:$0xf0]  ;;  %v1536_v29 = vld [vmem:[#allocation5 + $0x24] sm:$0xf] }
  0xee   :  { %v215_v0 = vadd.f32 1.0, %v214_v8  ;;  %v208_v10 = vadd.f32 1.0, %v207_v22  ;;  %1156 = vmatpush.bf16.msrb.mxu0 %v1399_v59  ;;  %v1391_v7 = vor.u32 %v1537_v55, %v1390_v4  ;;  %v1392_v22 = vld [vmem:[#allocation5 + $0x28] sm:$0xf0] }
  0xef   :  { %v361_v52 = vadd.f32 -0.4999988, %v360_v26  ;;  %v368_v11 = vadd.f32 -0.16666654, %v367_v17  ;;  %1169 = vmatpush.bf16.msrb.mxu1 %v1471_v3  ;;  %v1395_v8 = vor.u32 %v1536_v29, %v1392_v22  ;;  %v1555_v26 = vld [vmem:[#allocation5 + $0xb4] sm:$0xf0] }
  0xf0   :  { %v216_v13 = vmul.f32 %v215_v0, %v2015_v9  ;;  %v225_v6 = vxor.u32 2147483648, %v208_v10  ;;  %v1554_v17 = vld [vmem:[#allocation5 + $0xb4] sm:$0xf]  ;;  %v1463_v0 = vor.u32 %v1555_v26, %v1462_v35 }
  0xf1   :  { %v362_v20 = vmul.f32 %v361_v52, %v357_v23  ;;  %v369_v61 = vmul.f32 %v368_v11, %v357_v23  ;;  %1197 = vmatpush.bf16.msrb.mxu3 %v1475_v39  ;;  %1185 = vmatpush.bf16.msrb.mxu2 %v1395_v8  ;;  %v1382_v52 = vld [vmem:[#allocation5 + $0x10] sm:$0xf]  ;;  %v1535_v11 = vld [vmem:[#allocation5 + $0x14] sm:$0xf0] }
  0xf2   :  { %v222_v21 = vxor.u32 2147483648, %v216_v13  ;;  %v226_v9 = vsel %vm224_vm1, %v225_v6, %v216_v13  ;;  %v535_v14 = vsel %vm533_vm0, %v225_v6, %v216_v13  ;;  %1157 = vmatpush.bf16.msrb.mxu0 %v1391_v7  ;;  %v1383_v13 = vor.u32 %v1535_v11, %v1382_v52  ;;  %v1456_v6 = vld [vmem:[#allocation5 + $0xa8] sm:$0xf0]  ;;  %v986_v7 = vld [vmem:[%s2061_s5] sm:$0x3]  ;;  %s1216_s5 = sshll.u32 %s1669_s14, 4  ;;  %s1217_s5 = int_to_ptr.vmem [resolvable:$true] %s1216_s5 }
  0xf3   :  { %v363_v28 = vadd.f32 1.0, %v362_v20  ;;  %v370_v37 = vadd.f32 1.0, %v369_v61  ;;  %1170 = vmatpush.bf16.msrb.mxu1 %v1463_v0  ;;  %v1387_v20 = vor.u32 %v1534_v16, %v1384_v53  ;;  %v1454_v61 = vld [vmem:[#allocation5 + $0xa0] sm:$0xf]  ;;  %v988_v8 = vperm.slane %v986_v7, 0 }
  0xf4   :  { %v223_v30 = vsel %vm221_vm14, %v208_v10, %v222_v21  ;;  %v532_v1 = vsel %vm530_vm15, %v208_v10, %v222_v21  ;;  %v1467_v10 = vor.u32 %v1554_v17, %v1464_v47  ;;  %v1553_v21 = vld [vmem:[#allocation5 + $0xa4] sm:$0xf0]  ;;  %v989_v47 = vperm.slane %v986_v7, 1 }
  0xf5   :  { %v371_v33 = vmul.f32 %v370_v37, %v2028_v46  ;;  %v380_v63 = vxor.u32 2147483648, %v363_v28  ;;  %v227_v15 = vsel %vm220_vm13, %v223_v30, %v226_v9  ;;  %v536_v38 = vsel %vm529_vm12, %v532_v1, %v535_v14  ;;  %1186 = vmatpush.bf16.msrb.mxu2 %v1387_v20  ;;  %v1374_v37 = vld [vmem:[#allocation5] sm:$0xf]  ;;  %v1533_v30 = vld [vmem:[#allocation5 + $0x4] sm:$0xf0] }
  0xf6   :  { %v228_v46 = vsel %vm217_vm8, nan, %v227_v15  ;;  %v537_v60 = vsel %vm217_vm8, nan, %v536_v38  ;;  %1198 = vmatpush.bf16.msrb.mxu3 %v1467_v10  ;;  %1158 = vmatpush.bf16.msrb.mxu0 %v1383_v13  ;;  %v1455_v48 = vor.u32 %v1553_v21, %v1454_v61  ;;  %v1376_v1 = vld [vmem:[#allocation5 + $0x8] sm:$0xf0]  ;;  %v1551_v14 = vld [vmem:[#allocation5 + $0x94] sm:$0xf0] }
  0xf7   :  { %v377_v50 = vxor.u32 2147483648, %v371_v33  ;;  %v381_v42 = vsel %vm379_vm6, %v380_v63, %v371_v33  ;;  %v689_v34 = vsel %vm687_vm7, %v380_v63, %v371_v33  ;;  %v1532_v33 = vld [vmem:[#allocation5 + $0x4] sm:$0xf]  ;;  %v1375_v63 = vor.u32 %v1533_v30, %v1374_v37  ;;  %v1550_v15 = vld [vmem:[#allocation5 + $0x94] sm:$0xf] }
  0xf8   :  { %1171 = vmatpush.bf16.msrb.mxu1 %v1455_v48  ;;  %v1379_v9 = vor.u32 %v1532_v33, %v1376_v1 }
  0xf9   :  { %v378_v40 = vsel %vm376_vm5, %v363_v28, %v377_v50  ;;  %v686_v43 = vsel %vm684_vm4, %v363_v28, %v377_v50  ;;  %v1459_v28 = vor.u32 %v1552_v27, %v1456_v6  ;;  %v1446_v50 = vld [vmem:[#allocation5 + $0x90] sm:$0xf] }
  0xfa   :  { %v382_v44 = vsel %vm375_vm2, %v378_v40, %v381_v42  ;;  %v690_v45 = vsel %vm683_vm3, %v686_v43, %v689_v34  ;;  %1159 = vmatpush.bf16.msrb.mxu0 %v1375_v63  ;;  %v1447_v38 = vor.u32 %v1551_v14, %v1446_v50  ;;  %v1448_v40 = vld [vmem:[#allocation5 + $0x98] sm:$0xf0]  ;;  %1187 = vmatpush.bf16.msrb.mxu2 %v1379_v9  ;;  %v1438_v43 = vld [vmem:[#allocation5 + $0x80] sm:$0xf]  ;;  %v1549_v34 = vld [vmem:[#allocation5 + $0x84] sm:$0xf0] }
  0xfb   :  { %v383_v49 = vsel %vm372_vm9, nan, %v382_v44  ;;  %v691_v23 = vsel %vm372_vm9, nan, %v690_v45  ;;  %1199 = vmatpush.bf16.msrb.mxu3 %v1459_v28  ;;  %v1451_v42 = vor.u32 %v1550_v15, %v1448_v40  ;;  %v1548_v44 = vld [vmem:[#allocation5 + $0x84] sm:$0xf]  ;;  %v1439_v45 = vor.u32 %v1549_v34, %v1438_v43 }
  0xfc   :  { %v692_v31 = vpack.c.bf16 %v383_v49, %v228_v46  ;;  %v693_v54 = vpack.c.bf16 %v691_v23, %v537_v60  ;;  %1172 = vmatpush.bf16.msrb.mxu1 %v1447_v38  ;;  %v1440_v46 = vld [vmem:[#allocation5 + $0x88] sm:$0xf0]  ;;  %v726_v60 = vld [vmem:[%s2059_s3] sm:$0x3] }
  0xfd   :  { %v1443_v49 = vor.u32 %v1548_v44, %v1440_v46  ;;  %v729_v5 = vperm.slane %v726_v60, 1 }
  0xfe   :  { %900 = vmatmul.bf16.vlgmr.msra.gmra.mxu0 %v692_v31  ;;  %914 = vmatmul.bf16.vlgmr.msra.gmra.mxu1 %v693_v54 }
  0xff   :  { %928 = vmatmul.bf16.vlgmr.msra.gmra.mxu2 %v692_v31  ;;  %942 = vmatmul.bf16.vlgmr.msra.gmra.mxu3 %v693_v54  ;;  %v728_v54 = vperm.slane %v726_v60, 0 }
 0x100   :  { %1200 = vmatpush.bf16.msrb.mxu3 %v1451_v42  ;;  %1173 = vmatpush.bf16.msrb.mxu1 %v1439_v45 }
 0x104   :  { %1201 = vmatpush.bf16.msrb.mxu3 %v1443_v49 }
 0x17b   :  { %v901_v23 = vpop.f32.mrf.mxu0  ;;  %v915_v31 = vpop.f32.mrf.mxu1 }
 0x17c   :  { %v902_v56 = vadd.f32 %v901_v23, %v728_v54 }
 0x17e   :  { %v916_v12 = vadd.f32 %v915_v31, %v902_v56 }
 0x180   :  { %v948_v62 = vmax.f32 %v916_v12, 0.0 }
 0x182   :  { %v929_v36 = vpop.f32.mrf.mxu2  ;;  %v943_v2 = vpop.f32.mrf.mxu3 }
 0x183   :  { %v903_v57 = vpop.f32.mrf.mxu0  ;;  %v917_v24 = vpop.f32.mrf.mxu1  ;;  %v930_v59 = vadd.f32 %v929_v36, %v729_v5 }
 0x184   :  { %v904_v58 = vadd.f32 %v903_v57, %v728_v54 }
 0x185   :  { %v944_v41 = vadd.f32 %v943_v2, %v930_v59 }
 0x186   :  { %v918_v51 = vadd.f32 %v917_v24, %v904_v58 }
 0x187   :  { %v949_v4 = vmax.f32 %v944_v41, 0.0 }
 0x188   :  { %v950_v18 = vmax.f32 %v918_v51, 0.0 }
 0x18a   :  { %v952_v19 = vpack.c.bf16 %v950_v18, %v948_v62  ;;  %v931_v32 = vpop.f32.mrf.mxu2  ;;  %v945_v25 = vpop.f32.mrf.mxu3 }
 0x18b   :  { %v932_v3 = vadd.f32 %v931_v32, %v729_v5 }
 0x18c   :  { %1160 = vmatmul.bf16.vlgmr.msrb.gmra.mxu0 %v952_v19  ;;  %1188 = vmatmul.bf16.vlgmr.msrb.gmra.mxu2 %v952_v19 }
 0x18d   :  { %v946_v39 = vadd.f32 %v945_v25, %v932_v3 }
 0x18f   :  { %v951_v55 = vmax.f32 %v946_v39, 0.0 }
 0x191   :  { %v953_v29 = vpack.c.bf16 %v951_v55, %v949_v4 }
 0x193   :  { %1174 = vmatmul.bf16.vlgmr.msrb.gmra.mxu1 %v953_v29  ;;  %1202 = vmatmul.bf16.vlgmr.msrb.gmra.mxu3 %v953_v29 }
 0x209   :  { %v1161_v22 = vpop.f32.mrf.mxu0 }
 0x20a   :  { %v1162_v35 = vadd.f32 %v1161_v22, %v988_v8 }
 0x20f   :  { %v1189_v17 = vpop.f32.mrf.mxu2 }
 0x210   :  { %v1175_v26 = vpop.f32.mrf.mxu1  ;;  %v1190_v52 = vadd.f32 %v1189_v17, %v989_v47 }
 0x211   :  { %v1176_v0 = vadd.f32 %v1175_v26, %v1162_v35  ;;  %v1163_v10 = vpop.f32.mrf.mxu0 }
 0x212   :  { %v1164_v16 = vadd.f32 %v1163_v10, %v988_v8 }
 0x213   :  { %1208 = vst [vmem:[#allocation7] sm:$0xff] %v1176_v0 }
 0x216   :  { %v1203_v11 = vpop.f32.mrf.mxu3 }
 0x217   :  { %v1204_v13 = vadd.f32 %v1203_v11, %v1190_v52  ;;  %v1191_v61 = vpop.f32.mrf.mxu2 }
 0x218   :  { %v1177_v53 = vpop.f32.mrf.mxu1  ;;  %v1192_v21 = vadd.f32 %v1191_v61, %v989_v47 }
 0x219   :  { %1209 = vst [vmem:[#allocation7 + $0x8] sm:$0xff] %v1204_v13  ;;  %v1178_v20 = vadd.f32 %v1177_v53, %v1164_v16 }
 0x21b   :  { %1210 = vst [vmem:[#allocation7 + $0x10] sm:$0xff] %v1178_v20 }
 0x21e   :  { %v1205_v27 = vpop.f32.mrf.mxu3 }
 0x21f   :  { %v1206_v48 = vadd.f32 %v1205_v27, %v1192_v21 }
 0x221   :  { %1211 = vst [vmem:[#allocation7 + $0x18] sm:$0xff] %v1206_v48 }
 0x222   :  { %1224 = dma.vmem_to_hbm [thread:$0]  %s1217_s5, 512, %s1219_s17, [#allocation4], %s1670_s18, %s1670_s18, %s1671_s19  }
 0x223   :  { %1656 = dma.done.wait [#allocation4], 512  }
 0x224   :  { %1657 = vsyncadd [#allocation4], 4294966784 }
 0x225   :  { %1229 = vsyncpa [#allocation3], 1 }
 0x226   :  { %1230 = vsyncpa [#allocation6], 1 }
 0x227   :  { %1231 = vsyncpa [#allocation4], 1 }

</bundles_post_ra>
